<compile_context>
chip_gen: v5e
topology: v5e:2x2
jax: 0.10.0
libtpu: 0.0.40
codegen_flags: <defaults>
</compile_context>

<pallas_src>
import jax
import jax.numpy as jnp
from jax import lax
from jax.experimental import pallas as pl
from jax.experimental.pallas import tpu as pltpu

_LANE = 128   # vreg lane width (last-dim tiling unit)
_MXU = 256    # v6e/v7x MXU edge; 256-multiples also fine on v5e (two 128 pushes)


def _round_up(n, m):
    return (n + m - 1) // m * m


def _sublane(dtype):
    # bf16 packs 2 rows per 32-bit sublane: keep row tiles 16-aligned for it.
    return 16 if jnp.dtype(dtype).itemsize < 4 else 8


def _pad2(a, rows, cols):
    r, c = a.shape
    if (r, c) == (rows, cols):
        return a                      # skip the extra XLA pad pass over x / W
    return jnp.pad(a, ((0, rows - r), (0, cols - c)))


def _pad1(a, n):
    return a if a.shape[0] == n else jnp.pad(a, (0, n - a.shape[0]))


def _vmem_budget():
    """Return (physical_vmem_bytes, usable_budget_bytes) for this chip."""
    try:
        cap = int(pltpu.get_tpu_info().vmem_capacity_bytes)
    except Exception:
        cap = 64 << 20                # conservative fallback (v7x-sized)
    if cap <= (64 << 20):             # v7x: 64 MiB per TensorCore
        return cap, 48 << 20
    return cap, 100 << 20             # v5e / v6e: 128 MiB physical


# ----------------------------- kernel bodies ------------------------------
def _single_block_kernel(x_ref, w_ref, b_ref, o_ref):
    # x: (Bp, Kp); w: (Np, Kp) in PyTorch (out, in) layout; contract dim 1 of both.
    acc = lax.dot_general(
        x_ref[...], w_ref[...],
        dimension_numbers=(((1,), (1,)), ((), ())),
        preferred_element_type=jnp.float32,
    )
    o_ref[...] = (acc + b_ref[...]).astype(o_ref.dtype)


def _fused_k_kernel(x_ref, w_ref, b_ref, o_ref):
    # Whole contraction lives in the block: no accumulator scratch, no k loop,
    # output tile written exactly once with a full lane-dense store.
    acc = lax.dot_general(
        x_ref[...], w_ref[...],
        dimension_numbers=(((1,), (1,)), ((), ())),
        preferred_element_type=jnp.float32,
    )
    o_ref[...] = (acc + b_ref[...]).astype(o_ref.dtype)


def _split_k_kernel(x_ref, w_ref, b_ref, o_ref, acc_ref):
    k = pl.program_id(2)

    @pl.when(k == 0)
    def _init():
        acc_ref[...] = jnp.zeros_like(acc_ref)

    acc_ref[...] += lax.dot_general(
        x_ref[...], w_ref[...],
        dimension_numbers=(((1,), (1,)), ((), ())),
        preferred_element_type=jnp.float32,
    )

    @pl.when(k == pl.num_programs(2) - 1)
    def _finalize():
        o_ref[...] = (acc_ref[...] + b_ref[...]).astype(o_ref.dtype)


# ----------------------- single-block path (small shapes) ------------------
def _linreg_single_block(x, weight, bias, out_dtype):
    B, K = x.shape
    N = weight.shape[0]
    in_sz = jnp.dtype(x.dtype).itemsize
    sub = _sublane(x.dtype)
    Bp, Kp, Np = _round_up(B, sub), _round_up(K, _LANE), _round_up(N, _LANE)
    xp = _pad2(x, Bp, Kp)
    wp = _pad2(weight, Np, Kp)
    bp = _pad1(bias, Np).reshape(1, Np)

    need = ((Bp * Kp + Np * Kp) * in_sz
            + Bp * Np * jnp.dtype(out_dtype).itemsize + Np * 4)
    vmem_limit = int(min(max(2 * need, 4 << 20), 32 << 20))

    out = pl.pallas_call(
        _single_block_kernel,
        out_shape=jax.ShapeDtypeStruct((Bp, Np), out_dtype),
        # No grid / no BlockSpecs: whole (padded) arrays are single VMEM blocks
        # — zero per-grid-step pipeline overhead for small shapes.
        compiler_params=pltpu.CompilerParams(vmem_limit_bytes=vmem_limit),
    )(xp, wp, bp)
    return out[:B, :N]


# ----------------------------- tiled GEMM path ------------------------------
def _linreg_tiled(x, weight, bias, out_dtype, *, tm=None, tn=None, tk=None):
    B, K = x.shape
    N = weight.shape[0]
    in_sz = jnp.dtype(x.dtype).itemsize
    out_sz = jnp.dtype(out_dtype).itemsize
    sub = _sublane(x.dtype)
    cap, budget = _vmem_budget()
    two_cores = cap <= (64 << 20)     # v7x heuristic: 2 TensorCores / chip

    Kp = _round_up(K, _LANE)

    # ---- tile selection (auto unless pinned by the caller) -----------------
    tm = min(512, _round_up(B, sub)) if tm is None else _round_up(tm, sub)
    tn = min(512, _round_up(N, _LANE)) if tn is None else _round_up(tn, _LANE)

    def fused_need(tm_, tn_):
        # double-buffered x & W tiles + bias tile + double-buffered out tile
        return (2 * (tm_ + tn_) * Kp * in_sz + 2 * tn_ * 4
                + 2 * tm_ * tn_ * out_sz)

    def split_need(tm_, tn_, tk_):
        return (2 * (tm_ + tn_) * tk_ * in_sz + 2 * tn_ * 4
                + 2 * tm_ * tn_ * out_sz + tm_ * tn_ * 4)   # + f32 acc scratch

    if tk is None:
        # Prefer collapsing K entirely; shrink M/N tiles (never below one MXU
        # edge) until the fused-K working set fits this chip's VMEM budget.
        while fused_need(tm, tn) > budget and max(tm, tn) > _MXU:
            if tm >= tn:
                tm = max(_MXU, tm // 2)
            else:
                tn = max(_MXU, tn // 2)
        fuse_k = fused_need(tm, tn) <= budget
        tk = Kp if fuse_k else 512
    else:
        tk = _round_up(min(tk, Kp), _LANE)
        fuse_k = tk >= Kp

    if fuse_k:
        tk = Kp
        need = fused_need(tm, tn)
    else:
        # Split-K fallback for very long K: clamp tiles into the VMEM budget.
        while split_need(tm, tn, tk) > budget and tk > _MXU:
            tk = max(_MXU, tk // 2)
        while split_need(tm, tn, tk) > budget and max(tm, tn) > _MXU:
            if tm >= tn:
                tm = max(_MXU, tm // 2)
            else:
                tn = max(_MXU, tn // 2)
        Kp = _round_up(K, tk)
        need = split_need(tm, tn, tk)

    if need > budget:
        raise ValueError(
            f"tiles (tm={tm}, tn={tn}, tk={tk}) need {need} B of VMEM; budget "
            f"is {budget} B on this chip ({cap} B physical VMEM)")

    # v7x shards the 'parallel' axes over 2 TensorCores: keep >= 2 programs in
    # the M x N grid so one core isn't idle.
    if two_cores:
        while ((_round_up(B, tm) // tm) * (_round_up(N, tn) // tn) < 2
               and tm >= 2 * sub):
            tm = _round_up(tm // 2, sub)

    Bp, Np = _round_up(B, tm), _round_up(N, tn)
    xp = _pad2(x, Bp, Kp)
    wp = _pad2(weight, Np, Kp)
    bp = _pad1(bias, Np).reshape(1, Np)

    vmem_limit = int(min(budget, max(need + (2 << 20), 8 << 20)))

    if fuse_k:
        out = pl.pallas_call(
            _fused_k_kernel,
            out_shape=jax.ShapeDtypeStruct((Bp, Np), out_dtype),
            grid_spec=pltpu.PrefetchScalarGridSpec(
                num_scalar_prefetch=0,
                grid=(Bp // tm, Np // tn),
                in_specs=[
                    pl.BlockSpec((tm, Kp), lambda i, j: (i, 0)),   # x tile
                    pl.BlockSpec((tn, Kp), lambda i, j: (j, 0)),   # W tile (out,in)
                    pl.BlockSpec((1, tn), lambda i, j: (0, j)),    # bias tile
                ],
                out_specs=pl.BlockSpec((tm, tn), lambda i, j: (i, j)),
            ),
            compiler_params=pltpu.CompilerParams(
                dimension_semantics=("parallel", "parallel"),
                vmem_limit_bytes=vmem_limit,
            ),
        )(xp, wp, bp)
    else:
        out = pl.pallas_call(
            _split_k_kernel,
            out_shape=jax.ShapeDtypeStruct((Bp, Np), out_dtype),
            grid_spec=pltpu.PrefetchScalarGridSpec(
                num_scalar_prefetch=0,
                grid=(Bp // tm, Np // tn, Kp // tk),
                in_specs=[
                    pl.BlockSpec((tm, tk), lambda i, j, k: (i, k)),
                    pl.BlockSpec((tn, tk), lambda i, j, k: (j, k)),
                    pl.BlockSpec((1, tn), lambda i, j, k: (0, j)),
                ],
                out_specs=pl.BlockSpec((tm, tn), lambda i, j, k: (i, j)),
                scratch_shapes=[pltpu.VMEM((tm, tn), jnp.float32)],
            ),
            compiler_params=pltpu.CompilerParams(
                dimension_semantics=("parallel", "parallel", "arbitrary"),
                vmem_limit_bytes=vmem_limit,
            ),
        )(xp, wp, bp)
    return out[:B, :N]


# ------------------------------- public wrapper -----------------------------
def linear_regression_forward(x, weight, bias, *, mode="auto",
                              compute_dtype=None, tm=None, tn=None, tk=None):
    """Forward of LinearRegressionModel.

    x: (B, D_in); weight: (D_out, D_in) [PyTorch nn.Linear layout]; bias: (D_out,).
    compute_dtype=jnp.bfloat16 halves HBM traffic for production sizes (f32
    accumulation is kept via preferred_element_type; output stays in x.dtype).
    """
    out_dtype = x.dtype
    bias = bias.astype(jnp.float32)
    if compute_dtype is not None:
        x = x.astype(compute_dtype)
        weight = weight.astype(compute_dtype)

    if mode == "single":
        return _linreg_single_block(x, weight, bias, out_dtype)
    if mode == "tiled":
        return _linreg_tiled(x, weight, bias, out_dtype, tm=tm, tn=tn, tk=tk)

    # auto: grid-less single block while the padded operands fit one VMEM block
    B, K = x.shape
    N = weight.shape[0]
    in_sz = jnp.dtype(x.dtype).itemsize
    sub = _sublane(x.dtype)
    Bp, Kp, Np = _round_up(B, sub), _round_up(K, _LANE), _round_up(N, _LANE)
    bytes_single = ((Bp * Kp + Np * Kp) * in_sz
                    + Bp * Np * jnp.dtype(out_dtype).itemsize + Np * 4)
    if bytes_single <= (16 << 20):
        return _linreg_single_block(x, weight, bias, out_dtype)
    return _linreg_tiled(x, weight, bias, out_dtype, tm=tm, tn=tn, tk=tk)


if __name__ == "__main__":
    key = jax.random.PRNGKey(0)
    k1, k2, k3, k4, k5 = jax.random.split(key, 5)

    # ---- Spec-faithful toy case: LinearRegressionModel(input_dim=3, output_dim=1)
    input_dim, output_dim, batch = 3, 1, 8
    x = jax.random.normal(k1, (batch, input_dim), dtype=jnp.float32)
    weight = jnp.zeros((output_dim, input_dim), dtype=jnp.float32)  # nn.init.zeros_
    bound = 1.0 / (input_dim ** 0.5)
    bias = jax.random.uniform(k2, (output_dim,), jnp.float32, -bound, bound)

    y = jax.block_until_ready(linear_regression_forward(x, weight, bias))
    y_ref = x @ weight.T + bias
    assert y.shape == (batch, output_dim)
    assert jnp.allclose(y, y_ref, atol=1e-6), (y, y_ref)

    # ---- Same grid-less single-block path with non-trivial weights
    w_nz = jax.random.normal(k3, (output_dim, input_dim), dtype=jnp.float32)
    y2 = jax.block_until_ready(linear_regression_forward(x, w_nz, bias))
    assert jnp.allclose(y2, x @ w_nz.T + bias, atol=1e-5)

    # ---- Tiled K-collapsed path (f32), modest production-ish size
    Bb, Din, Dout = 256, 512, 256
    xb = jax.random.normal(k4, (Bb, Din), dtype=jnp.float32)
    wb = jax.random.normal(k5, (Dout, Din), dtype=jnp.float32) * 0.02
    bb = jax.random.uniform(k2, (Dout,), jnp.float32, -0.1, 0.1)
    yb = jax.block_until_ready(linear_regression_forward(xb, wb, bb, mode="tiled"))
    yb_ref = xb @ wb.T + bb
    assert yb.shape == (Bb, Dout)
    assert jnp.allclose(yb, yb_ref, rtol=1e-5, atol=1e-3)

    # ---- Same shapes through the bf16 compute path (f32 accumulation)
    yb16 = jax.block_until_ready(
        linear_regression_forward(xb, wb, bb, mode="tiled",
                                  compute_dtype=jnp.bfloat16))
    assert yb16.dtype == xb.dtype
    assert jnp.allclose(yb16, yb_ref, rtol=5e-2, atol=5e-2)

    # ---- Force the split-K accumulator fallback to keep it exercised
    yk = jax.block_until_ready(
        linear_regression_forward(xb, wb, bb, mode="tiled", tm=128, tn=128, tk=256))
    assert jnp.allclose(yk, yb_ref, rtol=1e-5, atol=1e-3)

    print("KERNEL_OK")
</pallas_src>

<mosaic_0001>
module attributes {stable_mosaic.version = 11 : i64} {
  func.func @_single_block_kernel(%arg0: memref<8x128xf32, #tpu.memory_space<vmem>>, %arg1: memref<128x128xf32, #tpu.memory_space<vmem>>, %arg2: memref<1x128xf32, #tpu.memory_space<vmem>>, %arg3: memref<8x128xf32, #tpu.memory_space<vmem>>) attributes {dimension_semantics = [], scalar_prefetch = 0 : i64, scratch_operands = 0 : i64, tpu.core_type = #tpu.core_type<tc>} {
    %c0 = arith.constant 0 : index
    %c0_0 = arith.constant 0 : index
    %0 = vector.load %arg0[%c0, %c0_0] : memref<8x128xf32, #tpu.memory_space<vmem>>, vector<8x128xf32>
    %c0_1 = arith.constant 0 : index
    %c0_2 = arith.constant 0 : index
    %1 = vector.load %arg1[%c0_1, %c0_2] : memref<128x128xf32, #tpu.memory_space<vmem>>, vector<128x128xf32>
    %cst = arith.constant dense<0.000000e+00> : vector<8x128xf32>
    %2 = tpu.matmul %0, %1, %cst {dimension_numbers = #tpu.dot_dimension_numbers<[1], [1], [0], [0], [0, 0, 1, 0], [], []>} : vector<8x128xf32>, vector<128x128xf32>, vector<8x128xf32> -> vector<8x128xf32>
    %c0_3 = arith.constant 0 : index
    %c0_4 = arith.constant 0 : index
    %3 = vector.load %arg2[%c0_3, %c0_4] : memref<1x128xf32, #tpu.memory_space<vmem>>, vector<1x128xf32>
    %4 = vector.broadcast %3 : vector<1x128xf32> to vector<8x128xf32>
    %5 = arith.addf %2, %4 : vector<8x128xf32>
    %c0_5 = arith.constant 0 : index
    %c0_6 = arith.constant 0 : index
    %6 = vector.load %arg3[%c0_5, %c0_6] : memref<8x128xf32, #tpu.memory_space<vmem>>, vector<8x128xf32>
    tpu.vector_store %arg3[%c0_5, %c0_6], %5 {strides = array<i32>} : memref<8x128xf32, #tpu.memory_space<vmem>>, vector<8x128xf32>,
    return
  }
}

</mosaic_0001>

<bundles_post_ra>
// kernel: tpu_custom_call.1
= control target key start
LH: loop header
LB: loop body
LE: loop exit
PB: predicated region body
PF: predicated region fallthrough
CT: control target
= control target key end

     0   :  { %8 = vsyncpa [#allocation3], 0  ;;  %s226_s0 = inlined_call_operand.hbm [shape: f32[8,128], index: 0, kind: input, shape index: {}]   ;;  %s227_s1 = inlined_call_operand.hbm [shape: f32[128,128], index: 1, kind: input, shape index: {}]   ;;  %s228_s2 = inlined_call_operand.vmem [shape: f32[1,128], index: 2, kind: input, shape index: {}]   ;;  %s229_s3 = inlined_call_operand.hbm [shape: f32[8,128], index: 3, kind: output, shape index: {}]  }
   0x1   :  { %9 = vsyncpa [#allocation6], 0 }
   0x2   :  { %10 = vsyncpa [#allocation4], 0  ;;  %s16_s14 = sshll.u32 %s226_s0, 4  ;;  %s189_s15 = smov [#allocation2]   ;;  %s17_s14 = int_to_ptr.hbm [resolvable:$true] %s16_s14 }
   0x3   :  { %s18_s16 = sshll.u32 %s189_s15, 4  ;;  %s26_s19 = sshll.u32 %s227_s1, 4  ;;  %s19_s16 = int_to_ptr.vmem [resolvable:$true] %s18_s16  ;;  %s27_s19 = int_to_ptr.hbm [resolvable:$true] %s26_s19 }
   0x4   :  { %21 = dma.hbm_to_vmem [thread:$0]  %s17_s14, 128, %s19_s16, [#allocation3]  }
   0x5   :  { %s190_s20 = smov [#allocation5]   ;;  %s191_s22 = smov 128  }
   0x6   :  { %s28_s21 = sshll.u32 %s190_s20, 4  ;;  %s192_s23 = smov 8   ;;  %s29_s21 = int_to_ptr.vmem [resolvable:$true] %s28_s21 }
   0x7   :  { %34 = dma.hbm_to_vmem [thread:$0]  %s27_s19, 2048, %s29_s21, [#allocation6], %s191_s22, %s191_s22, %s192_s23  }
   0x8   :  { %183 = dma.done.wait [#allocation3], 128  }
   0x9   :  { %184 = vsyncadd [#allocation3], 4294967168 }
   0xa   :  { %185 = dma.done.wait [#allocation6], 2048  }
   0xb   :  { %186 = vsyncadd [#allocation6], 4294965248  ;;  %v61_v0 = vld [vmem:[#allocation5 + $0x78] sm:$0xff]  ;;  %v60_v1 = vld [vmem:[#allocation5 + $0x70] sm:$0xff]  ;;  %s193_s24 = smov [#allocation7]   ;;  %s94_s28 = sshll.u32 %s229_s3, 4  ;;  %s95_s28 = int_to_ptr.hbm [resolvable:$true] %s94_s28 }
   0xc   :  { %66 = vmatpush.xpose.msra.mxu0 %v61_v0  ;;  %v59_v2 = vld [vmem:[#allocation5 + $0x68] sm:$0xff]  ;;  %v58_v3 = vld [vmem:[#allocation5 + $0x60] sm:$0xff]  ;;  %v57_v4 = vld [vmem:[#allocation5 + $0x58] sm:$0xff]  ;;  %s92_s25 = sshll.u32 %s193_s24, 4  ;;  %s93_s25 = int_to_ptr.vmem [resolvable:$true] %s92_s25 }
   0xd   :  { %v56_v5 = vld [vmem:[#allocation5 + $0x50] sm:$0xff]  ;;  %v55_v6 = vld [vmem:[#allocation5 + $0x48] sm:$0xff]  ;;  %v54_v7 = vld [vmem:[#allocation5 + $0x40] sm:$0xff] }
   0xe   :  { %v53_v8 = vld [vmem:[#allocation5 + $0x38] sm:$0xff]  ;;  %v52_v9 = vld [vmem:[#allocation5 + $0x30] sm:$0xff]  ;;  %v51_v10 = vld [vmem:[#allocation5 + $0x28] sm:$0xff] }
   0xf   :  { %v50_v11 = vld [vmem:[#allocation5 + $0x20] sm:$0xff]  ;;  %v49_v12 = vld [vmem:[#allocation5 + $0x18] sm:$0xff]  ;;  %v48_v13 = vld [vmem:[#allocation5 + $0x10] sm:$0xff] }
  0x10   :  { %67 = vmatpush.xpose.msra.mxu0 %v60_v1  ;;  %v47_v14 = vld [vmem:[#allocation5 + $0x8] sm:$0xff]  ;;  %v46_v15 = vld [vmem:[#allocation5] sm:$0xff]  ;;  %v45_v16 = vld [vmem:[#allocation2] sm:$0xff] }
  0x11   :  { %v110_v17 = vld [vmem:[%s228_s2] ss:$0 sm:$0xff] }
  0x14   :  { %68 = vmatpush.xpose.msra.mxu0 %v59_v2 }
  0x18   :  { %69 = vmatpush.xpose.msra.mxu0 %v58_v3 }
  0x1c   :  { %70 = vmatpush.xpose.msra.mxu0 %v57_v4 }
  0x20   :  { %71 = vmatpush.xpose.msra.mxu0 %v56_v5 }
  0x24   :  { %72 = vmatpush.xpose.msra.mxu0 %v55_v6 }
  0x28   :  { %73 = vmatpush.xpose.msra.mxu0 %v54_v7 }
  0x2c   :  { %74 = vmatpush.xpose.msra.mxu0 %v53_v8 }
  0x30   :  { %75 = vmatpush.xpose.msra.mxu0 %v52_v9 }
  0x34   :  { %76 = vmatpush.xpose.msra.mxu0 %v51_v10 }
  0x38   :  { %77 = vmatpush.xpose.msra.mxu0 %v50_v11 }
  0x3c   :  { %78 = vmatpush.xpose.msra.mxu0 %v49_v12 }
  0x40   :  { %79 = vmatpush.xpose.msra.mxu0 %v48_v13 }
  0x44   :  { %80 = vmatpush.xpose.msra.mxu0 %v47_v14 }
  0x48   :  { %81 = vmatpush.xpose.msra.mxu0 %v46_v15 }
  0x4b   :  { %82 = vmatmul.f32.vlgmr.msra.gmra.mxu0 %v45_v16 }
  0xc8   :  { %v83_v18 = vpop.f32.mrf.mxu0 }
  0xc9   :  { %v84_v19 = vadd.f32 %v110_v17, %v83_v18 }
  0xcb   :  { %86 = vst [vmem:[#allocation7] sm:$0xff] %v84_v19 }
  0xcc   :  { %97 = dma.vmem_to_hbm [thread:$0]  %s93_s25, 128, %s95_s28, [#allocation4]  }
  0xcd   :  { %187 = dma.done.wait [#allocation4], 128  }
  0xce   :  { %188 = vsyncadd [#allocation4], 4294967168 }
  0xcf   :  { %102 = vsyncpa [#allocation3], 1 }
  0xd0   :  { %103 = vsyncpa [#allocation6], 1 }
  0xd1   :  { %104 = vsyncpa [#allocation4], 1 }

</bundles_post_ra>
